<compile_context>
chip_gen: v5e
topology: v5e:2x2
jax: 0.10.0
libtpu: 0.0.40
codegen_flags: <defaults>
</compile_context>

<pallas_src>
import functools
import math

import jax
import jax.numpy as jnp
from jax import lax
from jax.experimental import pallas as pl
from jax.experimental.pallas import tpu as pltpu

LANE = 128
SUBLANE = 8
_VMEM_BLOCK_BUDGET = 8 * 1024 * 1024   # bytes of blocks (in+out, double-buffered)
_VMEM_LIMIT = 32 * 1024 * 1024         # explicit scoped-VMEM limit (safe v5e..v7x)


# ----------------------------------------------------------------------------
# Tile sizing helpers
# ----------------------------------------------------------------------------
def _cost(flops, bytes_accessed, transcendentals=0):
    return pl.CostEstimate(flops=int(flops), transcendentals=int(transcendentals),
                           bytes_accessed=int(bytes_accessed))


def _pick_row_tile(rows, row_bytes, min_steps=4):
    """Row tile: multiple of 8, sized from the VMEM budget, >= min grid steps."""
    if rows % SUBLANE != 0:
        return rows                                    # full-extent block (tiny/ragged)
    t_budget = max(SUBLANE, (_VMEM_BLOCK_BUDGET // max(row_bytes, 1)) // SUBLANE * SUBLANE)
    t_par = max(SUBLANE, (rows // min_steps) // SUBLANE * SUBLANE)
    return max(SUBLANE, min(rows, t_budget, t_par))


def _pick_lane_tile(lanes, col_bytes, batch_steps, min_steps=4):
    """Lane tile: multiple of 128, VMEM budget, enough grid steps for 2 TCs."""
    if lanes % LANE != 0:
        return lanes                                   # full-extent block (legal)
    t_budget = max(LANE, (_VMEM_BLOCK_BUDGET // max(col_bytes, 1)) // LANE * LANE)
    want = max(1, -(-min_steps // max(batch_steps, 1)))
    t_par = max(LANE, (lanes // want) // LANE * LANE)
    return max(LANE, min(lanes, t_budget, t_par))


# ----------------------------------------------------------------------------
# LayerNorm kernels (standalone LayerNorm module, both data formats)
# ----------------------------------------------------------------------------
def _ln_channels_first_kernel(x_ref, w_ref, b_ref, o_ref, *, eps):
    # x_ref: (1, C, T) -- C on sublanes, spatial (lane-dense) on lanes.
    x = x_ref[0].astype(jnp.float32)                   # (C, T)
    mean = jnp.mean(x, axis=0, keepdims=True)          # sublane reduce
    xc = x - mean
    var = jnp.mean(xc * xc, axis=0, keepdims=True)     # biased variance
    y = xc * lax.rsqrt(var + eps)
    y = y * w_ref[0].astype(jnp.float32) + b_ref[0].astype(jnp.float32)
    o_ref[0] = y.astype(o_ref.dtype)


def _ln_rows_kernel(x_ref, w_ref, b_ref, o_ref, *, eps):
    # Plain layout: one logical row per kernel row, normalized axis on lanes.
    x = x_ref[...].astype(jnp.float32)                 # (T, C)
    mean = jnp.mean(x, axis=-1, keepdims=True)
    xc = x - mean
    var = jnp.mean(xc * xc, axis=-1, keepdims=True)
    y = xc * lax.rsqrt(var + eps)
    o_ref[...] = (y * w_ref[...].astype(jnp.float32)
                  + b_ref[...].astype(jnp.float32)).astype(o_ref.dtype)


def _ln_rows_grouped_kernel(x_ref, m_ref, w_ref, b_ref, o_ref, *, eps, c):
    # Lane-dense layout: each 128-lane kernel row packs G = 128 // c logical
    # rows.  Group mean/var via a block-diagonal ones matmul (MXU).
    x = x_ref[...].astype(jnp.float32)                 # (T, G*C) = (T, 128)
    m = m_ref[...]                                     # (128, 128) block-diag ones
    inv_c = 1.0 / c
    mean = jnp.dot(x, m, preferred_element_type=jnp.float32) * inv_c
    xc = x - mean
    var = jnp.dot(xc * xc, m, preferred_element_type=jnp.float32) * inv_c
    y = xc * lax.rsqrt(var + eps)
    o_ref[...] = (y * w_ref[...] + b_ref[...]).astype(o_ref.dtype)


# ----------------------------------------------------------------------------
# LayerNorm wrappers
# ----------------------------------------------------------------------------
def layernorm_channels_first(x, weight, bias, eps):
    """LayerNorm over the channel axis of an NCHW tensor, no transposes."""
    assert x.ndim == 4
    b, c, h, w = x.shape
    hw = h * w
    x3 = x.reshape(b, c, hw)                           # free reshape
    itemsize = x.dtype.itemsize
    t = _pick_lane_tile(hw, col_bytes=2 * 2 * c * itemsize, batch_steps=b)
    grid = (b, pl.cdiv(hw, t))
    w3 = weight.astype(jnp.float32).reshape(1, c, 1)
    b3 = bias.astype(jnp.float32).reshape(1, c, 1)
    out = pl.pallas_call(
        functools.partial(_ln_channels_first_kernel, eps=eps),
        out_shape=jax.ShapeDtypeStruct((b, c, hw), x.dtype),
        grid_spec=pltpu.PrefetchScalarGridSpec(
            num_scalar_prefetch=0,
            grid=grid,
            in_specs=[
                pl.BlockSpec((1, c, t), lambda i, j: (i, 0, j)),
                pl.BlockSpec((1, c, 1), lambda i, j: (0, 0, 0)),
                pl.BlockSpec((1, c, 1), lambda i, j: (0, 0, 0)),
            ],
            out_specs=pl.BlockSpec((1, c, t), lambda i, j: (i, 0, j)),
        ),
        compiler_params=pltpu.CompilerParams(
            dimension_semantics=("parallel", "parallel"),
            vmem_limit_bytes=_VMEM_LIMIT),
        cost_estimate=_cost(flops=10 * b * c * hw,
                            bytes_accessed=2 * b * c * hw * itemsize,
                            transcendentals=b * hw),
    )(x3, w3, b3)
    return out.reshape(b, c, h, w)


def layernorm_channels_last(x, weight, bias, eps):
    """LayerNorm over the last axis of an (..., C) tensor."""
    c = x.shape[-1]
    rows = math.prod(x.shape[:-1])
    x2 = x.reshape(rows, c)
    itemsize = x.dtype.itemsize
    cp = pltpu.CompilerParams(dimension_semantics=("parallel",),
                              vmem_limit_bytes=_VMEM_LIMIT)

    g = LANE // c if (c <= LANE and LANE % c == 0) else 1
    if g > 1 and rows % g == 0 and (rows // g) % SUBLANE == 0:
        # Lane-dense path: pack G logical rows per 128-lane kernel row.
        rows_p = rows // g
        gc = g * c
        xp = x2.reshape(rows_p, gc)                    # free reshape
        gid = jnp.arange(gc, dtype=jnp.int32) // c
        m = (gid[:, None] == gid[None, :]).astype(jnp.float32)
        wt = jnp.tile(weight.astype(jnp.float32).reshape(1, c), (1, g))
        bt = jnp.tile(bias.astype(jnp.float32).reshape(1, c), (1, g))
        t = _pick_row_tile(rows_p, row_bytes=2 * 2 * gc * itemsize)
        out = pl.pallas_call(
            functools.partial(_ln_rows_grouped_kernel, eps=eps, c=c),
            out_shape=jax.ShapeDtypeStruct((rows_p, gc), x.dtype),
            grid_spec=pltpu.PrefetchScalarGridSpec(
                num_scalar_prefetch=0,
                grid=(pl.cdiv(rows_p, t),),
                in_specs=[pl.BlockSpec((t, gc), lambda i: (i, 0)),
                          pl.BlockSpec((gc, gc), lambda i: (0, 0)),
                          pl.BlockSpec((1, gc), lambda i: (0, 0)),
                          pl.BlockSpec((1, gc), lambda i: (0, 0))],
                out_specs=pl.BlockSpec((t, gc), lambda i: (i, 0)),
            ),
            compiler_params=cp,
            cost_estimate=_cost(flops=rows_p * gc * (4 * gc + 10),
                                bytes_accessed=2 * rows * c * itemsize,
                                transcendentals=rows),
        )(xp, m, wt, bt)
        return out.reshape(x.shape)

    # Fallback: plain per-row layout (used when C is 128-aligned or ragged).
    t = _pick_row_tile(rows, row_bytes=2 * 2 * c * itemsize)
    out = pl.pallas_call(
        functools.partial(_ln_rows_kernel, eps=eps),
        out_shape=jax.ShapeDtypeStruct((rows, c), x.dtype),
        grid_spec=pltpu.PrefetchScalarGridSpec(
            num_scalar_prefetch=0,
            grid=(pl.cdiv(rows, t),),
            in_specs=[pl.BlockSpec((t, c), lambda i: (i, 0)),
                      pl.BlockSpec((1, c), lambda i: (0, 0)),
                      pl.BlockSpec((1, c), lambda i: (0, 0))],
            out_specs=pl.BlockSpec((t, c), lambda i: (i, 0)),
        ),
        compiler_params=cp,
        cost_estimate=_cost(flops=10 * rows * c,
                            bytes_accessed=2 * rows * c * itemsize,
                            transcendentals=rows),
    )(x2, weight.astype(jnp.float32).reshape(1, c),
      bias.astype(jnp.float32).reshape(1, c))
    return out.reshape(x.shape)


class LayerNormPallas:
    """Mirror of the PyTorch LayerNorm module (forward only, both formats)."""

    def __init__(self, normalized_shape, eps=1e-6, data_format="channels_last"):
        if data_format not in ("channels_last", "channels_first"):
            raise ValueError(f"not support data format '{data_format}'")
        self.weight = jnp.ones((normalized_shape,), jnp.float32)
        self.bias = jnp.zeros((normalized_shape,), jnp.float32)
        self.eps = eps
        self.data_format = data_format
        self.normalized_shape = normalized_shape

    def __call__(self, x):
        if self.data_format == "channels_last":
            assert x.shape[-1] == self.normalized_shape
            return layernorm_channels_last(x, self.weight, self.bias, self.eps)
        assert x.shape[1] == self.normalized_shape
        return layernorm_channels_first(x, self.weight, self.bias, self.eps)


# ----------------------------------------------------------------------------
# Fused branch kernels: (rows, K) @ A + b  ->  channels LayerNorm  ->  (rows, C)
# ----------------------------------------------------------------------------
def _affine_ln_kernel(x_ref, a_ref, b_ref, g_ref, beta_ref, o_ref, *, eps):
    z = jnp.dot(x_ref[...].astype(jnp.float32), a_ref[...],
                preferred_element_type=jnp.float32) + b_ref[...]
    mean = jnp.mean(z, axis=-1, keepdims=True)
    zc = z - mean
    var = jnp.mean(zc * zc, axis=-1, keepdims=True)
    y = zc * lax.rsqrt(var + eps) * g_ref[...] + beta_ref[...]
    o_ref[...] = y.astype(o_ref.dtype)


def _affine_ln_grouped_kernel(x_ref, a_ref, b_ref, m_ref, g_ref, beta_ref,
                              o_ref, *, eps, c):
    # G = 128 // c logical rows per 128-lane kernel row; block-diagonal affine
    # map on the MXU, per-group LN stats via block-diagonal ones matmul.
    z = jnp.dot(x_ref[...].astype(jnp.float32), a_ref[...],
                preferred_element_type=jnp.float32) + b_ref[...]   # (T, 128)
    m = m_ref[...]                                                 # (128, 128)
    inv_c = 1.0 / c
    mean = jnp.dot(z, m, preferred_element_type=jnp.float32) * inv_c
    zc = z - mean
    var = jnp.dot(zc * zc, m, preferred_element_type=jnp.float32) * inv_c
    y = zc * lax.rsqrt(var + eps) * g_ref[...] + beta_ref[...]
    o_ref[...] = y.astype(o_ref.dtype)


def _affine_ln_branch(x2, a_mat, b_vec, gamma, beta, eps):
    """Per row r: y_r = LayerNorm(x_r @ A + b) * gamma + beta, one pallas_call."""
    rows, k = x2.shape
    c = a_mat.shape[1]
    kp = -(-k // SUBLANE) * SUBLANE
    if kp != k:                              # zero-pad contraction dim to x8
        x2 = jnp.pad(x2, ((0, 0), (0, kp - k)))
        a_mat = jnp.pad(a_mat, ((0, kp - k), (0, 0)))
    a_mat = a_mat.astype(jnp.float32)
    itemsize = x2.dtype.itemsize
    cp = pltpu.CompilerParams(dimension_semantics=("parallel",),
                              vmem_limit_bytes=_VMEM_LIMIT)

    g = LANE // c if (c <= LANE and LANE % c == 0) else 1
    if g > 1 and rows % g == 0:
        # Lane-dense path: pack G rows per kernel row; output stores are wide.
        rows_p = rows // g
        gk, gc = g * kp, g * c
        xp = x2.reshape(rows_p, gk)                                  # free reshape
        a_bd = jnp.kron(jnp.eye(g, dtype=jnp.float32), a_mat)        # (gk, gc) block-diag
        b_t = jnp.tile(b_vec.astype(jnp.float32).reshape(1, c), (1, g))
        g_t = jnp.tile(gamma.astype(jnp.float32).reshape(1, c), (1, g))
        be_t = jnp.tile(beta.astype(jnp.float32).reshape(1, c), (1, g))
        gid = jnp.arange(gc, dtype=jnp.int32) // c
        m = (gid[:, None] == gid[None, :]).astype(jnp.float32)
        t = _pick_row_tile(rows_p, row_bytes=2 * 2 * (gk + gc) * itemsize)
        out = pl.pallas_call(
            functools.partial(_affine_ln_grouped_kernel, eps=eps, c=c),
            out_shape=jax.ShapeDtypeStruct((rows_p, gc), x2.dtype),
            grid_spec=pltpu.PrefetchScalarGridSpec(
                num_scalar_prefetch=0,
                grid=(pl.cdiv(rows_p, t),),
                in_specs=[pl.BlockSpec((t, gk), lambda i: (i, 0)),
                          pl.BlockSpec((gk, gc), lambda i: (0, 0)),
                          pl.BlockSpec((1, gc), lambda i: (0, 0)),
                          pl.BlockSpec((gc, gc), lambda i: (0, 0)),
                          pl.BlockSpec((1, gc), lambda i: (0, 0)),
                          pl.BlockSpec((1, gc), lambda i: (0, 0))],
                out_specs=pl.BlockSpec((t, gc), lambda i: (i, 0)),
            ),
            compiler_params=cp,
            cost_estimate=_cost(flops=2 * rows_p * gk * gc + 4 * rows_p * gc * gc
                                      + 10 * rows * c,
                                bytes_accessed=(rows * (kp + c) + gk * gc + gc * gc)
                                               * itemsize,
                                transcendentals=rows),
        )(xp, a_bd, b_t, m, g_t, be_t)
        return out.reshape(rows, c)

    # Fallback: one logical row per kernel row (used when 128 % C != 0).
    t = _pick_row_tile(rows, row_bytes=2 * 2 * (kp + c) * itemsize)
    out = pl.pallas_call(
        functools.partial(_affine_ln_kernel, eps=eps),
        out_shape=jax.ShapeDtypeStruct((rows, c), x2.dtype),
        grid_spec=pltpu.PrefetchScalarGridSpec(
            num_scalar_prefetch=0,
            grid=(pl.cdiv(rows, t),),
            in_specs=[pl.BlockSpec((t, kp), lambda i: (i, 0)),
                      pl.BlockSpec((kp, c), lambda i: (0, 0)),
                      pl.BlockSpec((1, c), lambda i: (0, 0)),
                      pl.BlockSpec((1, c), lambda i: (0, 0)),
                      pl.BlockSpec((1, c), lambda i: (0, 0))],
            out_specs=pl.BlockSpec((t, c), lambda i: (i, 0)),
        ),
        compiler_params=cp,
        cost_estimate=_cost(flops=2 * rows * kp * c + 10 * rows * c,
                            bytes_accessed=(rows * (kp + c) + kp * c) * itemsize,
                            transcendentals=rows),
    )(x2, a_mat, b_vec.astype(jnp.float32).reshape(1, c),
      gamma.astype(jnp.float32).reshape(1, c),
      beta.astype(jnp.float32).reshape(1, c))
    return out


# ----------------------------------------------------------------------------
# Exact affine composition of each branch's (1, k) conv chain (done at init)
# ----------------------------------------------------------------------------
def _compose_pk(w1, b1, w2, b2, w3, b3):
    """conv(1,2,s2) -> conv(1,2,s2) -> conv(1,10): exact affine map R^40 -> R^C."""
    c = w1.shape[0]
    k1 = w1[:, 0, 0, :]                                # (C, 2)
    k2 = w2[:, :, 0, :]                                # (C, C, 2)
    k3 = w3[:, :, 0, :]                                # (C, C, 10)
    t2 = jnp.einsum("abk,bl->akl", k2, k1).reshape(c, 4)        # col j2 = 2k + l
    bb2 = jnp.einsum("abk,b->a", k2, b1) + b2
    a = jnp.einsum("acw,cj->awj", k3, t2).reshape(c, 40)        # col = 4w + j2
    bt = jnp.einsum("acw,c->a", k3, bb2) + b3
    return a.T, bt                                              # (40, C), (C,)


def _compose_trade(w1, b1, w2, b2):
    """conv(1,3,s3) -> conv(1,2,s2): exact affine map R^6 -> R^C per output col."""
    c = w1.shape[0]
    k1 = w1[:, 0, 0, :]                                # (C, 3)
    k2 = w2[:, :, 0, :]                                # (C, C, 2)
    a = jnp.einsum("abk,bl->akl", k2, k1).reshape(c, 6)         # col = 3k + l
    bt = jnp.einsum("abk,b->a", k2, b1) + b2
    return a.T, bt                                              # (6, C), (C,)


def _conv_init(key, co, ci, kw):
    # Deterministic example params (PyTorch-style uniform(+-1/sqrt(fan_in))).
    kw_key, kb_key = jax.random.split(key)
    bound = 1.0 / float(ci * kw) ** 0.5
    w = jax.random.uniform(kw_key, (co, ci, 1, kw), jnp.float32, -bound, bound)
    b = jax.random.uniform(kb_key, (co,), jnp.float32, -bound, bound)
    return w, b


# ----------------------------------------------------------------------------
# stem_same_channel (forward)
# ----------------------------------------------------------------------------
class StemSameChannelPallas:
    """Pallas port of `stem_same_channel` (forward only, normal='ln')."""

    def __init__(self, use_trade_data, use_pk_data, stem_alpha=1, normal="ln",
                 key=None, eps=1e-6):
        assert use_trade_data or use_pk_data
        if normal != "ln":
            # TODO(synk): BatchNorm2d ('bn') option (stateful running stats) not ported.
            raise NotImplementedError("only normal='ln' is ported to Pallas")
        if key is None:
            key = jax.random.PRNGKey(0)
        self.eps = eps
        self.out_channel = int(24 * stem_alpha)
        self.pk = None
        self.trade = None
        if use_trade_data and use_pk_data:
            pk_c = int(self.out_channel * (2 / 3))
            trade_c = self.out_channel - pk_c
        elif use_pk_data:
            pk_c, trade_c = self.out_channel, 0
        else:
            pk_c, trade_c = 0, self.out_channel
        k_pk, k_tr = jax.random.split(key)
        if use_pk_data:
            k1, k2, k3 = jax.random.split(k_pk, 3)
            w1, b1 = _conv_init(k1, pk_c, 1, 2)
            w2, b2 = _conv_init(k2, pk_c, pk_c, 2)
            w3, b3 = _conv_init(k3, pk_c, pk_c, 10)
            a_pk, bt_pk = _compose_pk(w1, b1, w2, b2, w3, b3)
            self.pk = dict(w1=w1, b1=b1, w2=w2, b2=b2, w3=w3, b3=b3,
                           A=a_pk, b=bt_pk,
                           ln_w=jnp.ones((pk_c,), jnp.float32),
                           ln_b=jnp.zeros((pk_c,), jnp.float32))
        if use_trade_data:
            k1, k2 = jax.random.split(k_tr)
            w1, b1 = _conv_init(k1, trade_c, 1, 3)
            w2, b2 = _conv_init(k2, trade_c, trade_c, 2)
            a_tr, bt_tr = _compose_trade(w1, b1, w2, b2)
            self.trade = dict(w1=w1, b1=b1, w2=w2, b2=b2,
                              A=a_tr, b=bt_tr,
                              ln_w=jnp.ones((trade_c,), jnp.float32),
                              ln_b=jnp.zeros((trade_c,), jnp.float32))

    def __call__(self, combine_x):
        # combine_x: (B, 1, H, W_total) NCHW, like the PyTorch module.
        b, _, h, w_tot = combine_x.shape
        x1 = None
        if self.pk is not None:
            p = self.pk
            c = p["A"].shape[1]
            assert w_tot >= 40, "pk branch needs at least 40 input columns"
            xp = combine_x[:, 0, :, :40].reshape(b * h, 40)      # one 40-col window -> 1 out
            y = _affine_ln_branch(xp, p["A"], p["b"], p["ln_w"], p["ln_b"], self.eps)
            x1 = jnp.transpose(y.reshape(b, h, 1, c), (0, 3, 1, 2))   # tiny NHWC -> NCHW
        x2 = None
        if self.trade is not None:
            p = self.trade
            c = p["A"].shape[1]
            w_tr = w_tot - 40
            wo = (w_tr // 3) // 2                                # valid-conv output width
            assert wo >= 1, "trade branch needs at least 6 input columns"
            xt = combine_x[:, 0, :, 40:40 + wo * 6].reshape(b * h * wo, 6)
            y = _affine_ln_branch(xt, p["A"], p["b"], p["ln_w"], p["ln_b"], self.eps)
            x2 = jnp.transpose(y.reshape(b, h, wo, c), (0, 3, 1, 2))
        if x1 is None:
            return x2
        if x2 is None:
            return x1
        return jnp.concatenate((x1, x2), axis=1)


# ----------------------------------------------------------------------------
# Pure-JAX references (for correctness checks only)
# ----------------------------------------------------------------------------
def _ref_conv(x, w, b, stride_w):
    y = lax.conv_general_dilated(x, w, window_strides=(1, stride_w),
                                 padding="VALID",
                                 dimension_numbers=("NCHW", "OIHW", "NCHW"),
                                 precision=lax.Precision.HIGHEST)
    return y + b[None, :, None, None]


def _ref_ln_cf(x, w, b, eps):
    mean = jnp.mean(x, axis=1, keepdims=True)
    var = jnp.mean((x - mean) ** 2, axis=1, keepdims=True)
    return w[None, :, None, None] * ((x - mean) / jnp.sqrt(var + eps)) \
        + b[None, :, None, None]


def _ref_ln_cl(x, w, b, eps):
    mean = jnp.mean(x, axis=-1, keepdims=True)
    var = jnp.mean((x - mean) ** 2, axis=-1, keepdims=True)
    return (x - mean) / jnp.sqrt(var + eps) * w + b


def _ref_stem(pk, trade, x, eps=1e-6):
    outs = []
    if pk is not None:
        p = x[:, :, :, :40]
        p = _ref_conv(p, pk["w1"], pk["b1"], 2)
        p = _ref_conv(p, pk["w2"], pk["b2"], 2)
        p = _ref_conv(p, pk["w3"], pk["b3"], 1)
        outs.append(_ref_ln_cf(p, pk["ln_w"], pk["ln_b"], eps))
    if trade is not None:
        t = x[:, :, :, 40:]
        t = _ref_conv(t, trade["w1"], trade["b1"], 3)
        t = _ref_conv(t, trade["w2"], trade["b2"], 2)
        outs.append(_ref_ln_cf(t, trade["ln_w"], trade["ln_b"], eps))
    return outs[0] if len(outs) == 1 else jnp.concatenate(outs, axis=1)


if __name__ == "__main__":
    key = jax.random.PRNGKey(0)
    k_x, k_cf, k_cl, k_stem, k_stem2 = jax.random.split(key, 5)

    # ---- standalone LayerNorm kernels (both data formats) ----
    B, C, H, W = 2, 4, 16, 16
    x_cf = jax.random.normal(k_cf, (B, C, H, W), jnp.float32)
    ln_cf = LayerNormPallas(C, eps=1e-6, data_format="channels_first")
    y_cf = jax.block_until_ready(ln_cf(x_cf))
    assert y_cf.shape == (B, C, H, W)
    assert jnp.max(jnp.abs(y_cf - _ref_ln_cf(x_cf, ln_cf.weight, ln_cf.bias, 1e-6))) < 1e-4

    x_cl = jax.random.normal(k_cl, (B, H, W, C), jnp.float32)
    ln_cl = LayerNormPallas(C, eps=1e-6, data_format="channels_last")
    y_cl = jax.block_until_ready(ln_cl(x_cl))
    assert y_cl.shape == (B, H, W, C)
    # Grouped (lane-dense) path does its reduction on the MXU; tolerance covers
    # MXU pass precision while still catching any layout/indexing bug (O(1)).
    assert jnp.max(jnp.abs(y_cl - _ref_ln_cl(x_cl, ln_cl.weight, ln_cl.bias, 1e-6))) < 2e-2

    # ---- full stem_same_channel forward (both branches, grouped kernels) ----
    Bs, Hs, Wtot = 2, 16, 46          # pk slice = 40 cols, trade slice = 6 cols
    x = jax.random.normal(k_x, (Bs, 1, Hs, Wtot), jnp.float32)
    stem = StemSameChannelPallas(use_trade_data=True, use_pk_data=True,
                                 stem_alpha=1, normal="ln", key=k_stem)
    fwd = jax.jit(stem.__call__)
    y = jax.block_until_ready(fwd(x))
    assert y.shape == (Bs, 24, Hs, 1), y.shape
    ref = _ref_stem(stem.pk, stem.trade, x)
    # Affine map + LN statistics both run through the MXU -> loose-but-O(1)-
    # bug-catching tolerance (reference uses HIGHEST-precision conv chains).
    assert jnp.max(jnp.abs(y - ref)) < 3e-2, float(jnp.max(jnp.abs(y - ref)))

    # ---- pk-only stem (C=24 does not divide 128 -> fallback kernel path) ----
    stem_pk = StemSameChannelPallas(use_trade_data=False, use_pk_data=True,
                                    stem_alpha=1, normal="ln", key=k_stem2)
    y_pk = jax.block_until_ready(jax.jit(stem_pk.__call__)(x))
    assert y_pk.shape == (Bs, 24, Hs, 1), y_pk.shape
    ref_pk = _ref_stem(stem_pk.pk, None, x)
    assert jnp.max(jnp.abs(y_pk - ref_pk)) < 3e-2, float(jnp.max(jnp.abs(y_pk - ref_pk)))

    print("KERNEL_OK")
</pallas_src>

<mosaic_0001>
module attributes {stable_mosaic.version = 11 : i64} {
  func.func @_ln_channels_first_kernel(%arg0: i32, %arg1: i32, %arg2: memref<1x4x128xf32, #tpu.memory_space<vmem>>, %arg3: memref<1x4x1xf32, #tpu.memory_space<vmem>>, %arg4: memref<1x4x1xf32, #tpu.memory_space<vmem>>, %arg5: memref<1x4x128xf32, #tpu.memory_space<vmem>>) attributes {dimension_semantics = [#tpu.dimension_semantics<parallel>, #tpu.dimension_semantics<parallel>], iteration_bounds = array<i64: 2, 2>, scalar_prefetch = 0 : i64, scratch_operands = 0 : i64, tpu.core_type = #tpu.core_type<tc>, window_params = [{transform_indices = @transform_0, window_bounds = array<i64: 1, 4, 128>}, {pipeline_mode = #tpu.pipeline_mode<synchronous>, transform_indices = @transform_1, window_bounds = array<i64: 1, 4, 1>}, {pipeline_mode = #tpu.pipeline_mode<synchronous>, transform_indices = @transform_2, window_bounds = array<i64: 1, 4, 1>}, {transform_indices = @transform_3, window_bounds = array<i64: 1, 4, 128>}]} {
    %c0 = arith.constant 0 : index
    %c0_0 = arith.constant 0 : index
    %c0_1 = arith.constant 0 : index
    %0 = vector.load %arg2[%c0, %c0_0, %c0_1] : memref<1x4x128xf32, #tpu.memory_space<vmem>>, vector<1x4x128xf32>
    %1 = vector.shape_cast %0 : vector<1x4x128xf32> to vector<4x128xf32>
    %cst = arith.constant dense<0.000000e+00> : vector<128xf32>
    %2 = vector.multi_reduction <add>, %1, %cst [0] : vector<4x128xf32> to vector<128xf32>
    %3 = vector.shape_cast %2 : vector<128xf32> to vector<1x128xf32>
    %cst_2 = arith.constant 4.000000e+00 : f32
    %4 = vector.broadcast %cst_2 : f32 to vector<1x128xf32>
    %5 = arith.divf %3, %4 : vector<1x128xf32>
    %6 = vector.broadcast %5 : vector<1x128xf32> to vector<4x128xf32>
    %7 = arith.subf %1, %6 : vector<4x128xf32>
    %8 = arith.mulf %7, %7 : vector<4x128xf32>
    %cst_3 = arith.constant dense<0.000000e+00> : vector<128xf32>
    %9 = vector.multi_reduction <add>, %8, %cst_3 [0] : vector<4x128xf32> to vector<128xf32>
    %10 = vector.shape_cast %9 : vector<128xf32> to vector<1x128xf32>
    %cst_4 = arith.constant 4.000000e+00 : f32
    %11 = vector.broadcast %cst_4 : f32 to vector<1x128xf32>
    %12 = arith.divf %10, %11 : vector<1x128xf32>
    %cst_5 = arith.constant 9.99999997E-7 : f32
    %13 = vector.broadcast %cst_5 : f32 to vector<1x128xf32>
    %14 = arith.addf %12, %13 : vector<1x128xf32>
    %15 = math.rsqrt %14 : vector<1x128xf32>
    %16 = vector.broadcast %15 : vector<1x128xf32> to vector<4x128xf32>
    %17 = arith.mulf %7, %16 : vector<4x128xf32>
    %c0_6 = arith.constant 0 : index
    %c0_7 = arith.constant 0 : index
    %c0_8 = arith.constant 0 : index
    %18 = vector.load %arg3[%c0_6, %c0_7, %c0_8] : memref<1x4x1xf32, #tpu.memory_space<vmem>>, vector<1x4x1xf32>
    %19 = vector.shape_cast %18 : vector<1x4x1xf32> to vector<4x1xf32>
    %20 = vector.broadcast %19 : vector<4x1xf32> to vector<4x128xf32>
    %21 = arith.mulf %17, %20 : vector<4x128xf32>
    %c0_9 = arith.constant 0 : index
    %c0_10 = arith.constant 0 : index
    %c0_11 = arith.constant 0 : index
    %22 = vector.load %arg4[%c0_9, %c0_10, %c0_11] : memref<1x4x1xf32, #tpu.memory_space<vmem>>, vector<1x4x1xf32>
    %23 = vector.shape_cast %22 : vector<1x4x1xf32> to vector<4x1xf32>
    %24 = vector.broadcast %23 : vector<4x1xf32> to vector<4x128xf32>
    %25 = arith.addf %21, %24 : vector<4x128xf32>
    %c0_12 = arith.constant 0 : index
    %c0_13 = arith.constant 0 : index
    %c0_14 = arith.constant 0 : index
    %26 = vector.load %arg5[%c0_12, %c0_13, %c0_14] : memref<1x4x128xf32, #tpu.memory_space<vmem>>, vector<1x4x128xf32>
    %27 = vector.shape_cast %26 : vector<1x4x128xf32> to vector<4x128xf32>
    %28 = vector.shape_cast %25 : vector<4x128xf32> to vector<1x4x128xf32>
    tpu.vector_store %arg5[%c0_12, %c0_13, %c0_14], %28 {strides = array<i32>} : memref<1x4x128xf32, #tpu.memory_space<vmem>>, vector<1x4x128xf32>,
    return
  }
  func.func @transform_0(%arg0: i32, %arg1: i32) -> (i32, i32, i32) {
    %c0_i32 = arith.constant 0 : i32
    %c0_i32_0 = arith.constant 0 : i32
    return %arg0, %c0_i32, %arg1 : i32, i32, i32
  }
  func.func @transform_1(%arg0: i32, %arg1: i32) -> (i32, i32, i32) {
    %c0_i32 = arith.constant 0 : i32
    %c0_i32_0 = arith.constant 0 : i32
    %c0_i32_1 = arith.constant 0 : i32
    %c0_i32_2 = arith.constant 0 : i32
    return %c0_i32, %c0_i32_0, %c0_i32_1 : i32, i32, i32
  }
  func.func @transform_2(%arg0: i32, %arg1: i32) -> (i32, i32, i32) {
    %c0_i32 = arith.constant 0 : i32
    %c0_i32_0 = arith.constant 0 : i32
    %c0_i32_1 = arith.constant 0 : i32
    %c0_i32_2 = arith.constant 0 : i32
    return %c0_i32, %c0_i32_0, %c0_i32_1 : i32, i32, i32
  }
  func.func @transform_3(%arg0: i32, %arg1: i32) -> (i32, i32, i32) {
    %c0_i32 = arith.constant 0 : i32
    %c0_i32_0 = arith.constant 0 : i32
    return %arg0, %c0_i32, %arg1 : i32, i32, i32
  }
}

</mosaic_0001>

<bundles_post_ra>
// kernel: tpu_custom_call.1
= control target key start
LH: loop header
LB: loop body
LE: loop exit
PB: predicated region body
PF: predicated region fallthrough
CT: control target
= control target key end

     0   :  { %8 = vsyncpa [#allocation3], 0  ;;  %s769_s0 = inlined_call_operand.hbm [shape: f32[2,4,256], index: 0, kind: input, shape index: {}]   ;;  %s770_s1 = inlined_call_operand.vmem [shape: f32[1,4,1], index: 1, kind: input, shape index: {}]   ;;  %s771_s2 = inlined_call_operand.vmem [shape: f32[1,4,1], index: 2, kind: input, shape index: {}]   ;;  %s772_s3 = inlined_call_operand.hbm [shape: f32[2,4,256], index: 3, kind: output, shape index: {}]  }
   0x1   :  { %10 = vsyncpa [#allocation3 + $0x1], 0 }
   0x2   :  { %11 = vsyncpa [#allocation4], 0 }
   0x3   :  { %13 = vsyncpa [#allocation4 + $0x1], 0  ;;  %s615_s12 = smov 0   ;;  %s617_s13 = smov 0  }
   0x4   :  { %s619_s14 = smov 0   ;;  %s621_s15 = smov 0  }
   0x5   :  { %s623_s16 = smov 0   ;;  %s625_s17 = smov 0  }
   0x6   :  { %s627_s18 = smov 0   ;;  %s629_s19 = smov 0  }
   0x7 LB: > { %s363_s20 = sadd.s32 4294967295, %s591_s19   ;;  %s364_s21 = sadd.s32 4294967294, %s591_s19   ;;  %s591_s19 = sphi %s629_s19, %s19_s19   ;;  %s587_s18 = sphi %s627_s18, %s786_s18   ;;  %s583_s17 = sphi %s625_s17, %s785_s17   ;;  %s579_s16 = sphi %s623_s16, %s784_s16   ;;  %s575_s15 = sphi %s621_s15, %s783_s15   ;;  %s571_s14 = sphi %s619_s14, %s782_s14   ;;  %s567_s13 = sphi %s617_s13, %s781_s13   ;;  %s563_s12 = sphi %s615_s12, %s780_s12  }
   0x8   : > { %s28_s22 = sadd.s32 1, %s583_s17  ;;  %s31_s23 = sadd.s32 1, %s587_s18 }
   0x9   : > { %p29_p0 = scmp.ge.s32.totalorder %s28_s22, 2  ;;  %s40_s24 = sadd.s32 1, %s571_s14 }
   0xa   : > { %p47_p1 = scmp.ne.s32.totalorder %s571_s14, %s567_s13  ;;  %p48_p2 = scmp.eq.s32.totalorder %s591_s19, 0 }
   0xb   : > { %s788_s22 = smov (%p29_p0, %s28_s22), 0  ;;  %s790_s23 = smov (!%p29_p0, %s31_s23), %s587_s18 }
   0xc   : > { %s36_s25 = ssub.s32 %s583_s17, %s788_s22  ;;  %p668_p3 = por %p48_p2, %p47_p1 }
   0xd   : > { %p33_p4 = scmp.ge.s32.totalorder %s790_s23, 2  ;;  %p53_p5 = scmp.ne.s32.totalorder %s567_s13, %s563_s12 }
   0xe   : > { %p54_p6 = scmp.eq.s32.totalorder %s363_s20, 0  ;;  %p121_p7 = scmp.eq.s32.totalorder %s363_s20, 3 }
   0xf   : > { %s792_s23 = smov (%p33_p4, %s790_s23), 0  ;;  %p127_p10 = scmp.eq.s32.totalorder %s364_s21, 3 }
  0x10   : > { %775 = sst [smem:[#allocation8_spill]] %s792_s23  ;;  %p676_p8 = por %p54_p6, %p53_p5 }
  0x11   : > { %p680_p9 = por %p121_p7, %p47_p1  ;;  %s35_s29 = ssub.s32 %s587_s18, %s792_s23 }
  0x12   : > { %s37_s30 = sor.u32 %s36_s25, %s35_s29  ;;  %p686_p12 = por %p127_p10, %p53_p5 }
  0x13   : > { %p38_p11 = scmp.eq.s32.totalorder %s37_s30, 0  ;;  %p390_p13 = scmp.lt.s32.totalorder %s591_s19, 4 }
  0x14   : > { %s153_s5 = sand.u32 1, %s571_s14   ;;  %s368_s8 = sshll.u32 %s587_s18, 1 }
  0x15   : > { %s693_s6 = scalar_select %p38_p11, %s571_s14, %s40_s24  }
  0x16   : > { %s367_s7 = sshll.u32 %s153_s5, 2  ;;  %s161_s9 = sadd.s32 %s583_s17, %s368_s8 }
  0x17   : > { %s157_s10 = scalar_lea.vmem [#allocation2], %s367_s7  ;;  %s369_s20 = sshll.u32 %s161_s9, 2 }
  0x18   : > { %s167_s11 = sshll.u32 %s157_s10, 4  ;;  %s163_s29 = scalar_lea.hbm %s769_s0, %s369_s20  ;;  %s168_s11 = int_to_ptr.vmem [resolvable:$true] %s167_s11 }
  0x19   : > { %p383_p0 = pnand %p390_p13, %p668_p3  ;;  %s165_s30 = sshll.u32 %s163_s29, 4  ;;  %s166_s30 = int_to_ptr.hbm [resolvable:$true] %s165_s30 }
  0x1a   : > { %p370_p1 = scmp.ge.s32.totalorder %s591_s19, 1  ;;  %s154_s23 = scalar_lea.sflag [#allocation3], %s153_s5 }
  0x1b   : > { %385 = dma.hbm_to_vmem [thread:$0]  (!%p383_p0), %s166_s30, 64, %s168_s11, %s154_s23  }
  0x1c   : > { %p172_p2 = scmp.lt.s32.totalorder %s591_s19, 5 }
  0x1e   : > { %p173_p4 = pnand %p370_p1, %p172_p2 }
  0x1f   : > { %s705_s24 = sand.u32 (!%p173_p4), 1, %s567_s13  }
  0x20   : > { %176 = sbr.rel (%p173_p4) target bundleno = 168 (0xa8), region = 32  ;;  %s371_s7 = sshll.u32 (!%p173_p4), %s705_s24, 2 }
  0x21   : > { %s179_s8 = scalar_lea.sflag (!%p173_p4), [#allocation3], %s705_s24  ;;  %s182_s26 = scalar_lea.vmem (!%p173_p4), [#allocation2], %s371_s7 }
  0x25   : > { %554 = dma.done.wait (%p676_p8), %s179_s8, 64  }
  0x26   : > { %556 = vsyncadd (%p676_p8), %s179_s8, 4294967232  ;;  %v593_v0 = vmov 0   ;;  %v245_v1 = vld [vmem:[%s770_s1] sm:$0xf]  ;;  %v594_v3 = vmov 4.0   ;;  %vm207_vm0 = vcmask 1043456  }
  0x27   : > { %458 = vset.pattern.permute.xlu0 %v593_v0  ;;  %v252_v2 = vld [vmem:[%s771_s2] sm:$0xf]  ;;  %459 = vrcp.f32 %v594_v3  ;;  %s374_s27 = sshll.u32 %s579_s16, 1  ;;  %s205_s30 = scalar_lea.vmem [#allocation5], %s371_s7 }
  0x28   : > { %248 = vperm.xlu0 %458, %v245_v1   ;;  %v206_v7 = vld [vmem:[%s182_s26] sm:$0xf]  ;;  %s271_s11 = sadd.s32 %s575_s15, %s374_s27  ;;  %s275_s8 = sshll.u32 %s205_s30, 4  ;;  %s276_s8 = int_to_ptr.vmem [resolvable:$true] %s275_s8 }
  0x29   : > { %v208_v8 = vsel %vm207_vm0, %v206_v7, 0.0  ;;  %s375_s20 = sshll.u32 %s271_s11, 2  ;;  %s261_s15 = scalar_lea.sflag [#allocation4], %s705_s24 }
  0x2a   : > { %v209_v9 = vrot.slane %v208_v8, 4  ;;  %s273_s29 = scalar_lea.hbm %s772_s3, %s375_s20  ;;  %s513_s7 = scalar_lea.hbm %s772_s3, 16 }
  0x2b   : > { %s277_s26 = sshll.u32 %s273_s29, 4  ;;  %s278_s26 = int_to_ptr.hbm [resolvable:$true] %s277_s26 }
  0x2c   : > { %v210_v11 = vadd.f32 %v209_v9, %v208_v8  ;;  %s507_s16 = sshra.s32 %s278_s26, 4  ;;  %s508_s16 = int_to_ptr.hbm [resolvable:$true] %s507_s16 }
  0x2d   : > { %v460_v4 = vpop.eup %459  ;;  %s509_s23 = scalar_lea.hbm %s508_s16, 4  ;;  %p514_p7 = scmp.lt.s32.totalorder %s508_s16, %s772_s3 }
  0x2e   : > { %v216_v5 = vmul.f32 4.0, %v460_v4  ;;  %v211_v12 = vrot.slane %v210_v11, 2  ;;  %vm220_vm1 = vweird.f32 %v460_v4  ;;  %p510_p3 = scmp.ne.s32.totalorder %s508_s16, %s509_s23  ;;  %p515_p8 = scmp.lt.s32.totalorder %s513_s7, %s509_s23 }
  0x30   : > { %255 = vperm.xlu0 %458, %v252_v2   ;;  %v217_v6 = vsub.f32 1.0, %v216_v5  ;;  %v212_v14 = vadd.f32 %v211_v12, %v210_v11  ;;  %p511_p5 = pnand %p510_p3, %p680_p9  ;;  %p516_p10 = por %p515_p8, %p514_p7 }
  0x32   : > { %v218_v10 = vmul.f32 %v460_v4, %v217_v6  ;;  %v213_v15 = vrot.slane %v212_v14, 1  ;;  %p512_p6 = pneg %p511_p5 }
  0x34   : > { %v219_v13 = vadd.f32 %v460_v4, %v218_v10  ;;  %v214_v17 = vadd.f32 %v213_v15, %v212_v14  ;;  %p517_p11 = pnand %p516_p10, %p512_p6 }
  0x36   : > { %v221_v16 = vsel %vm220_vm1, %v460_v4, %v219_v13 }
  0x37   : > { %v222_v18 = vmul.f32 %v221_v16, %v214_v17 }
  0x39   : > { %v223_v19 = vsub.f32 %v206_v7, %v222_v18 }
  0x3b   : > { %v224_v20 = vmul.f32 %v223_v19, %v223_v19 }
  0x3d   : > { %v225_v21 = vsel %vm207_vm0, %v224_v20, 0.0 }
  0x3e   : > { %v226_v22 = vrot.slane %v225_v21, 4 }
  0x40   : > { %v227_v23 = vadd.f32 %v226_v22, %v225_v21 }
  0x42   : > { %v228_v24 = vrot.slane %v227_v23, 2 }
  0x44   : > { %v229_v25 = vadd.f32 %v228_v24, %v227_v23 }
  0x46   : > { %v230_v26 = vrot.slane %v229_v25, 1 }
  0x48   : > { %v231_v27 = vadd.f32 %v230_v26, %v229_v25 }
  0x4a   : > { %v232_v28 = vmul.f32 %v231_v27, %v221_v16 }
  0x4c   : > { %v233_v29 = vadd.f32 1e-06, %v232_v28 }
  0x4e   : > { %461 = vrsqrt.f32 %v233_v29  ;;  %vm240_vm2 = vweird.f32 %v233_v29 }
  0x54   : > { %v462_v30 = vpop.eup %461 }
  0x55   : > { %v235_v31 = vmul.f32 %v462_v30, %v233_v29  ;;  %vm241_vm3 = vweird.f32 %v462_v30 }
  0x56   : > { %vm242_vm4 = vmor %vm240_vm2, %vm241_vm3 }
  0x57   : > { %v236_v32 = vmul.f32 %v462_v30, %v235_v31 }
  0x59   : > { %v237_v33 = vmul.f32 0.5, %v236_v32 }
  0x5b   : > { %v238_v34 = vsub.f32 1.5, %v237_v33 }
  0x5d   : > { %v239_v35 = vmul.f32 %v462_v30, %v238_v34 }
  0x5f   : > { %v243_v37 = vsel %vm242_vm4, %v462_v30, %v239_v35 }
  0x60   : > { %v244_v38 = vmul.f32 %v243_v37, %v223_v19 }
  0x9a   : > { %v249_v36 = vpop.permute.xlu0 %248 }
  0x9b   : > { %v251_v39 = vmul.f32 %v249_v36, %v244_v38 }
  0xa2   : > { %v256_v40 = vpop.permute.xlu0 %255 }
  0xa3   : > { %v258_v41 = vadd.f32 %v256_v40, %v251_v39 }
  0xa5   : > { %259 = vst [vmem:[%s205_s30] sm:$0xf] %v258_v41 }
  0xa6   : > { %520 = shalt.err (!%p517_p11)
}
  0xa7   : > { %380 = dma.vmem_to_hbm [thread:$0]  (%p680_p9), %s276_s8, 64, %s278_s26, %s261_s15  }
  0xa8 PF: > { %p391_p13 = scmp.ge.s32.totalorder %s591_s19, 2  ;;  %s289_s24 = sand.u32 1, %s563_s12  }
  0xa9   : > { %s290_s11 = scalar_lea.sflag [#allocation4], %s289_s24 }
  0xaa   : > { %p387_p0 = pnand %p391_p13, %p686_p12 }
  0xac   : > { %p388_p1 = pneg %p387_p0 }
  0xae   : > { %558 = dma.done.wait (%p388_p1), %s290_s11, 64  }
  0xaf   : > { %560 = vsyncadd (%p388_p1), %s290_s11, 4294967232  ;;  %s19_s19 = sadd.s32 1, %s591_s19   ;;  %s779_s28 = sld [smem:[#allocation8_spill]] }
  0xb0   : > { %p16_p2 = scmp.ge.s32.totalorder %s19_s19, 6   ;;  %s780_s12 = smov %s567_s13 }
  0xb1   : > { %s781_s13 = smov %s571_s14  ;;  %s782_s14 = smov %s693_s6 }
  0xb2   : > { %s783_s15 = smov %s583_s17  ;;  %s784_s16 = smov %s587_s18 }
  0xb3   : > { %s785_s17 = smov %s788_s22  ;;  %18 = sbr.rel (!%p16_p2) target bundleno = 7 (0x7), region = 77 }
  0xb5   : > { %s786_s18 = smov %s779_s28 }
  0xb8   :  { %296 = vsyncpa [#allocation3], 1 }
  0xb9   :  { %298 = vsyncpa [#allocation3 + $0x1], 1 }
  0xba   :  { %299 = vsyncpa [#allocation4], 1 }
  0xbb   :  { %301 = vsyncpa [#allocation4 + $0x1], 1 }

</bundles_post_ra>
